<compile_context>
chip_gen: v5e
topology: v5e:2x2
jax: 0.10.0
libtpu: 0.0.40
codegen_flags: <defaults>
</compile_context>

<pallas_src>
import functools

import jax
import jax.numpy as jnp
from jax import lax
from jax.experimental import pallas as pl
from jax.experimental.pallas import tpu as pltpu


def attention_kernel(x_ref, gamma_ref, beta_ref, wq_ref, wk_ref, wv_ref,
                     wo_ref, bout_ref, o_ref, q_s, k_s, v_s, acc_s,
                     *, heads, eps, q_tile):
    qi = pl.program_id(1)

    # ---- Once per batch element: LayerNorm + head-major Q/K/V projection ----
    @pl.when(qi == 0)
    def _():
        x = x_ref[0].astype(jnp.float32)                          # (N, D)
        mean = jnp.mean(x, axis=-1, keepdims=True)
        var = jnp.mean((x - mean) ** 2, axis=-1, keepdims=True)
        x_hat = (x - mean) * lax.rsqrt(var + eps)
        xn = (x_hat * gamma_ref[...].astype(jnp.float32)
              + beta_ref[...].astype(jnp.float32)).astype(x_ref.dtype)

        for h in range(heads):                                    # static unroll
            # Softmax scale already folded into wq in the wrapper.
            q_s[h] = jnp.dot(xn, wq_ref[h],
                             preferred_element_type=jnp.float32).astype(q_s.dtype)
            k_s[h] = jnp.dot(xn, wk_ref[h],
                             preferred_element_type=jnp.float32).astype(k_s.dtype)
            v_s[h] = jnp.dot(xn, wv_ref[h],
                             preferred_element_type=jnp.float32).astype(v_s.dtype)

    # ---- Per q-tile attention, folding head outputs into the output proj ----
    row0 = pl.multiple_of(qi * q_tile, q_tile)
    # Start the accumulator at the output-projection bias (broadcast rows).
    acc_s[...] = jnp.broadcast_to(bout_ref[...].astype(jnp.float32), acc_s.shape)

    for h in range(heads):                                        # static unroll
        qh = q_s[h, pl.ds(row0, q_tile), :]                       # (TQ, dh)
        kh = k_s[h]                                               # (N, dh)
        vh = v_s[h]                                               # (N, dh)

        # Contract over dim_head directly: no kh.T materialization.
        s = lax.dot_general(qh, kh, (((1,), (1,)), ((), ())),
                            preferred_element_type=jnp.float32)   # (TQ, N)
        m = jnp.max(s, axis=-1, keepdims=True)
        p = jnp.exp(s - m)
        l = jnp.sum(p, axis=-1, keepdims=True)

        oh = jnp.dot(p.astype(vh.dtype), vh,
                     preferred_element_type=jnp.float32)          # (TQ, dh)
        # Normalize on (TQ, dh), not (TQ, N); approx reciprocal -> EUP slot.
        oh = oh * pl.reciprocal(l, approx=True)

        # concat-over-heads followed by W_out == sum of per-head matmuls.
        acc_s[...] += jnp.dot(oh.astype(wo_ref.dtype), wo_ref[h],
                              preferred_element_type=jnp.float32)  # (TQ, D)

    o_ref[0] = acc_s[...].astype(o_ref.dtype)


def attention_forward(x, gamma, beta, w_qkv, w_out, b_out, *, heads, dim_head,
                      eps=1e-5, q_tile=None):
    B, N, D = x.shape
    inner = heads * dim_head
    assert w_qkv.shape == (D, 3 * inner)
    assert w_out.shape == (inner, D)
    scale = dim_head ** (-0.5)

    if q_tile is None:
        q_tile = N if N <= 128 else 128
    assert N % q_tile == 0, "N must be divisible by the q tile size"
    num_q_tiles = N // q_tile

    # Split QKV weights into head-major (H, D, dh) blocks; fold the softmax
    # scale into the Q weights so no per-score scaling happens in-kernel.
    w_q, w_k, w_v = jnp.split(w_qkv, 3, axis=-1)                  # each (D, inner)

    def head_major(w):
        return jnp.transpose(w.reshape(D, heads, dim_head), (1, 0, 2))  # (H, D, dh)

    w_q_h = head_major(w_q) * jnp.asarray(scale, w_qkv.dtype)
    w_k_h = head_major(w_k)
    w_v_h = head_major(w_v)
    w_o_h = w_out.reshape(heads, dim_head, D)                     # (H, dh, D)

    # 2-D (1, D) vectors for lane-dense, layout-friendly VMEM blocks.
    gamma2 = gamma.reshape(1, D)
    beta2 = beta.reshape(1, D)
    bout2 = b_out.reshape(1, D)

    kernel = functools.partial(attention_kernel, heads=heads, eps=eps,
                               q_tile=q_tile)

    return pl.pallas_call(
        kernel,
        out_shape=jax.ShapeDtypeStruct((B, N, D), x.dtype),
        grid_spec=pltpu.PrefetchScalarGridSpec(
            num_scalar_prefetch=0,
            grid=(B, num_q_tiles),
            in_specs=[
                pl.BlockSpec((1, N, D), lambda b, q: (b, 0, 0)),              # x (full seq, resident across q tiles)
                pl.BlockSpec((1, D), lambda b, q: (0, 0)),                    # LayerNorm gamma
                pl.BlockSpec((1, D), lambda b, q: (0, 0)),                    # LayerNorm beta
                pl.BlockSpec((heads, D, dim_head), lambda b, q: (0, 0, 0)),   # W_q (scale folded)
                pl.BlockSpec((heads, D, dim_head), lambda b, q: (0, 0, 0)),   # W_k
                pl.BlockSpec((heads, D, dim_head), lambda b, q: (0, 0, 0)),   # W_v
                pl.BlockSpec((heads, dim_head, D), lambda b, q: (0, 0, 0)),   # W_out (head-major)
                pl.BlockSpec((1, D), lambda b, q: (0, 0)),                    # b_out
            ],
            out_specs=pl.BlockSpec((1, q_tile, D), lambda b, q: (b, q, 0)),
            scratch_shapes=[
                pltpu.VMEM((heads, N, dim_head), x.dtype),   # Q (head-major)
                pltpu.VMEM((heads, N, dim_head), x.dtype),   # K
                pltpu.VMEM((heads, N, dim_head), x.dtype),   # V
                pltpu.VMEM((q_tile, D), jnp.float32),        # output accumulator
            ],
        ),
        compiler_params=pltpu.CompilerParams(
            dimension_semantics=("parallel", "arbitrary"),
            vmem_limit_bytes=48 * 1024 * 1024,
        ),
    )(x, gamma2, beta2, w_q_h, w_k_h, w_v_h, w_o_h, bout2)


def attention_reference(x, gamma, beta, w_qkv, w_out, b_out, *, heads,
                        dim_head, eps=1e-5):
    """Pure-JAX reference mirroring the PyTorch forward."""
    x32 = x.astype(jnp.float32)
    mean = jnp.mean(x32, axis=-1, keepdims=True)
    var = jnp.mean((x32 - mean) ** 2, axis=-1, keepdims=True)
    x_n = (x32 - mean) / jnp.sqrt(var + eps) * gamma + beta
    qkv = x_n @ w_qkv
    q, k, v = jnp.split(qkv, 3, axis=-1)
    B, N, _ = x.shape

    def split_heads(t):
        return t.reshape(B, N, heads, dim_head).transpose(0, 2, 1, 3)

    q, k, v = map(split_heads, (q, k, v))
    dots = jnp.einsum("bhnd,bhmd->bhnm", q, k) * (dim_head ** -0.5)
    attn = jax.nn.softmax(dots, axis=-1)
    out = jnp.einsum("bhnm,bhmd->bhnd", attn, v)
    out = out.transpose(0, 2, 1, 3).reshape(B, N, heads * dim_head)
    return (out @ w_out + b_out).astype(x.dtype)


if __name__ == "__main__":
    # Small shapes consistent with the module's forward: (batch, seq, dim)
    B, N, D = 2, 8, 32
    heads, dim_head = 4, 8
    inner = heads * dim_head

    key = jax.random.PRNGKey(0)
    kx, kqkv, kout, kb = jax.random.split(key, 4)

    x = jax.random.normal(kx, (B, N, D), dtype=jnp.float32)

    # Deterministic params (LayerNorm: gamma=1, beta=0; linears: small random)
    gamma = jnp.ones((D,), dtype=jnp.float32)
    beta = jnp.zeros((D,), dtype=jnp.float32)
    w_qkv = jax.random.normal(kqkv, (D, 3 * inner), dtype=jnp.float32) * 0.05
    w_out = jax.random.normal(kout, (inner, D), dtype=jnp.float32) * 0.05
    b_out = jax.random.normal(kb, (D,), dtype=jnp.float32) * 0.01

    # TODO(synk): dropout (p=0.0 / eval mode) is a no-op and is omitted.
    out = attention_forward(x, gamma, beta, w_qkv, w_out, b_out,
                            heads=heads, dim_head=dim_head)
    out = jax.block_until_ready(out)

    ref = attention_reference(x, gamma, beta, w_qkv, w_out, b_out,
                              heads=heads, dim_head=dim_head)
    assert out.shape == (B, N, D)
    # Tolerance accounts for the EUP approximate reciprocal in the softmax
    # normalization (pl.reciprocal(approx=True)); everything else is f32-exact.
    assert jnp.allclose(out, ref, atol=1e-3, rtol=1e-3), "mismatch vs reference"

    print("KERNEL_OK")
</pallas_src>

<mosaic_0001>
module attributes {stable_mosaic.version = 11 : i64} {
  func.func @attention_kernel(%arg0: i32, %arg1: i32, %arg2: memref<1x8x32xf32, #tpu.memory_space<vmem>>, %arg3: memref<1x32xf32, #tpu.memory_space<vmem>>, %arg4: memref<1x32xf32, #tpu.memory_space<vmem>>, %arg5: memref<4x32x8xf32, #tpu.memory_space<vmem>>, %arg6: memref<4x32x8xf32, #tpu.memory_space<vmem>>, %arg7: memref<4x32x8xf32, #tpu.memory_space<vmem>>, %arg8: memref<4x8x32xf32, #tpu.memory_space<vmem>>, %arg9: memref<1x32xf32, #tpu.memory_space<vmem>>, %arg10: memref<1x8x32xf32, #tpu.memory_space<vmem>>, %arg11: memref<4x8x8xf32, #tpu.memory_space<vmem>>, %arg12: memref<4x8x8xf32, #tpu.memory_space<vmem>>, %arg13: memref<4x8x8xf32, #tpu.memory_space<vmem>>, %arg14: memref<8x32xf32, #tpu.memory_space<vmem>>) attributes {dimension_semantics = [#tpu.dimension_semantics<parallel>, #tpu.dimension_semantics<arbitrary>], iteration_bounds = array<i64: 2, 1>, scalar_prefetch = 0 : i64, scratch_operands = 4 : i64, tpu.core_type = #tpu.core_type<tc>, window_params = [{transform_indices = @transform_0, window_bounds = array<i64: 1, 8, 32>}, {pipeline_mode = #tpu.pipeline_mode<synchronous>, transform_indices = @transform_1, window_bounds = array<i64: 1, 32>}, {pipeline_mode = #tpu.pipeline_mode<synchronous>, transform_indices = @transform_2, window_bounds = array<i64: 1, 32>}, {pipeline_mode = #tpu.pipeline_mode<synchronous>, transform_indices = @transform_3, window_bounds = array<i64: 4, 32, 8>}, {pipeline_mode = #tpu.pipeline_mode<synchronous>, transform_indices = @transform_4, window_bounds = array<i64: 4, 32, 8>}, {pipeline_mode = #tpu.pipeline_mode<synchronous>, transform_indices = @transform_5, window_bounds = array<i64: 4, 32, 8>}, {pipeline_mode = #tpu.pipeline_mode<synchronous>, transform_indices = @transform_6, window_bounds = array<i64: 4, 8, 32>}, {pipeline_mode = #tpu.pipeline_mode<synchronous>, transform_indices = @transform_7, window_bounds = array<i64: 1, 32>}, {transform_indices = @transform_8, window_bounds = array<i64: 1, 8, 32>}]} {
    %c0_i32 = arith.constant 0 : i32
    %0 = arith.cmpi eq, %arg1, %c0_i32 : i32
    %1 = arith.extui %0 : i1 to i32
    %c0_i32_0 = arith.constant 0 : i32
    %2 = arith.cmpi ne, %1, %c0_i32_0 : i32
    scf.if %2 {
      %c0_85 = arith.constant 0 : index
      %c0_86 = arith.constant 0 : index
      %c0_87 = arith.constant 0 : index
      %113 = vector.load %arg2[%c0_85, %c0_86, %c0_87] : memref<1x8x32xf32, #tpu.memory_space<vmem>>, vector<1x8x32xf32>
      %114 = vector.shape_cast %113 : vector<1x8x32xf32> to vector<8x32xf32>
      %cst_88 = arith.constant dense<0.000000e+00> : vector<8xf32>
      %115 = vector.multi_reduction <add>, %114, %cst_88 [1] : vector<8x32xf32> to vector<8xf32>
      %116 = vector.shape_cast %115 : vector<8xf32> to vector<8x1xf32>
      %cst_89 = arith.constant 3.200000e+01 : f32
      %117 = vector.broadcast %cst_89 : f32 to vector<8x1xf32>
      %118 = arith.divf %116, %117 : vector<8x1xf32>
      %119 = vector.broadcast %118 : vector<8x1xf32> to vector<8x32xf32>
      %120 = arith.subf %114, %119 : vector<8x32xf32>
      %121 = arith.mulf %120, %120 : vector<8x32xf32>
      %cst_90 = arith.constant dense<0.000000e+00> : vector<8xf32>
      %122 = vector.multi_reduction <add>, %121, %cst_90 [1] : vector<8x32xf32> to vector<8xf32>
      %123 = vector.shape_cast %122 : vector<8xf32> to vector<8x1xf32>
      %cst_91 = arith.constant 3.200000e+01 : f32
      %124 = vector.broadcast %cst_91 : f32 to vector<8x1xf32>
      %125 = arith.divf %123, %124 : vector<8x1xf32>
      %126 = vector.broadcast %118 : vector<8x1xf32> to vector<8x32xf32>
      %127 = arith.subf %114, %126 : vector<8x32xf32>
      %cst_92 = arith.constant 9.99999974E-6 : f32
      %128 = vector.broadcast %cst_92 : f32 to vector<8x1xf32>
      %129 = arith.addf %125, %128 : vector<8x1xf32>
      %130 = math.rsqrt %129 : vector<8x1xf32>
      %131 = vector.broadcast %130 : vector<8x1xf32> to vector<8x32xf32>
      %132 = arith.mulf %127, %131 : vector<8x32xf32>
      %c0_93 = arith.constant 0 : index
      %c0_94 = arith.constant 0 : index
      %133 = vector.load %arg3[%c0_93, %c0_94] : memref<1x32xf32, #tpu.memory_space<vmem>>, vector<1x32xf32>
      %134 = vector.broadcast %133 : vector<1x32xf32> to vector<8x32xf32>
      %135 = arith.mulf %132, %134 : vector<8x32xf32>
      %c0_95 = arith.constant 0 : index
      %c0_96 = arith.constant 0 : index
      %136 = vector.load %arg4[%c0_95, %c0_96] : memref<1x32xf32, #tpu.memory_space<vmem>>, vector<1x32xf32>
      %137 = vector.broadcast %136 : vector<1x32xf32> to vector<8x32xf32>
      %138 = arith.addf %135, %137 : vector<8x32xf32>
      %c0_97 = arith.constant 0 : index
      %c0_98 = arith.constant 0 : index
      %c0_99 = arith.constant 0 : index
      %139 = vector.load %arg5[%c0_97, %c0_98, %c0_99] : memref<4x32x8xf32, #tpu.memory_space<vmem>>, vector<1x32x8xf32>
      %140 = vector.shape_cast %139 : vector<1x32x8xf32> to vector<32x8xf32>
      %cst_100 = arith.constant dense<0.000000e+00> : vector<8x8xf32>
      %141 = tpu.matmul %138, %140, %cst_100 {dimension_numbers = #tpu.dot_dimension_numbers<[1], [0], [0], [1], [0, 0, 1, 1], [], []>} : vector<8x32xf32>, vector<32x8xf32>, vector<8x8xf32> -> vector<8x8xf32>
      %c0_101 = arith.constant 0 : index
      %c0_102 = arith.constant 0 : index
      %c0_103 = arith.constant 0 : index
      %142 = vector.load %arg11[%c0_101, %c0_102, %c0_103] : memref<4x8x8xf32, #tpu.memory_space<vmem>>, vector<1x8x8xf32>
      %143 = vector.shape_cast %142 : vector<1x8x8xf32> to vector<8x8xf32>
      %144 = vector.shape_cast %141 : vector<8x8xf32> to vector<1x8x8xf32>
      tpu.vector_store %arg11[%c0_101, %c0_102, %c0_103], %144 {strides = array<i32>} : memref<4x8x8xf32, #tpu.memory_space<vmem>>, vector<1x8x8xf32>,
      %c0_104 = arith.constant 0 : index
      %c0_105 = arith.constant 0 : index
      %c0_106 = arith.constant 0 : index
      %145 = vector.load %arg6[%c0_104, %c0_105, %c0_106] : memref<4x32x8xf32, #tpu.memory_space<vmem>>, vector<1x32x8xf32>
      %146 = vector.shape_cast %145 : vector<1x32x8xf32> to vector<32x8xf32>
      %cst_107 = arith.constant dense<0.000000e+00> : vector<8x8xf32>
      %147 = tpu.matmul %138, %146, %cst_107 {dimension_numbers = #tpu.dot_dimension_numbers<[1], [0], [0], [1], [0, 0, 1, 1], [], []>} : vector<8x32xf32>, vector<32x8xf32>, vector<8x8xf32> -> vector<8x8xf32>
      %c0_108 = arith.constant 0 : index
      %c0_109 = arith.constant 0 : index
      %c0_110 = arith.constant 0 : index
      %148 = vector.load %arg12[%c0_108, %c0_109, %c0_110] : memref<4x8x8xf32, #tpu.memory_space<vmem>>, vector<1x8x8xf32>
      %149 = vector.shape_cast %148 : vector<1x8x8xf32> to vector<8x8xf32>
      %150 = vector.shape_cast %147 : vector<8x8xf32> to vector<1x8x8xf32>
      tpu.vector_store %arg12[%c0_108, %c0_109, %c0_110], %150 {strides = array<i32>} : memref<4x8x8xf32, #tpu.memory_space<vmem>>, vector<1x8x8xf32>,
      %c0_111 = arith.constant 0 : index
      %c0_112 = arith.constant 0 : index
      %c0_113 = arith.constant 0 : index
      %151 = vector.load %arg7[%c0_111, %c0_112, %c0_113] : memref<4x32x8xf32, #tpu.memory_space<vmem>>, vector<1x32x8xf32>
      %152 = vector.shape_cast %151 : vector<1x32x8xf32> to vector<32x8xf32>
      %cst_114 = arith.constant dense<0.000000e+00> : vector<8x8xf32>
      %153 = tpu.matmul %138, %152, %cst_114 {dimension_numbers = #tpu.dot_dimension_numbers<[1], [0], [0], [1], [0, 0, 1, 1], [], []>} : vector<8x32xf32>, vector<32x8xf32>, vector<8x8xf32> -> vector<8x8xf32>
      %c0_115 = arith.constant 0 : index
      %c0_116 = arith.constant 0 : index
      %c0_117 = arith.constant 0 : index
      %154 = vector.load %arg13[%c0_115, %c0_116, %c0_117] : memref<4x8x8xf32, #tpu.memory_space<vmem>>, vector<1x8x8xf32>
      %155 = vector.shape_cast %154 : vector<1x8x8xf32> to vector<8x8xf32>
      %156 = vector.shape_cast %153 : vector<8x8xf32> to vector<1x8x8xf32>
      tpu.vector_store %arg13[%c0_115, %c0_116, %c0_117], %156 {strides = array<i32>} : memref<4x8x8xf32, #tpu.memory_space<vmem>>, vector<1x8x8xf32>,
      %c1_118 = arith.constant 1 : index
      %c0_119 = arith.constant 0 : index
      %c0_120 = arith.constant 0 : index
      %157 = vector.load %arg5[%c1_118, %c0_119, %c0_120] : memref<4x32x8xf32, #tpu.memory_space<vmem>>, vector<1x32x8xf32>
      %158 = vector.shape_cast %157 : vector<1x32x8xf32> to vector<32x8xf32>
      %cst_121 = arith.constant dense<0.000000e+00> : vector<8x8xf32>
      %159 = tpu.matmul %138, %158, %cst_121 {dimension_numbers = #tpu.dot_dimension_numbers<[1], [0], [0], [1], [0, 0, 1, 1], [], []>} : vector<8x32xf32>, vector<32x8xf32>, vector<8x8xf32> -> vector<8x8xf32>
      %c1_122 = arith.constant 1 : index
      %c0_123 = arith.constant 0 : index
      %c0_124 = arith.constant 0 : index
      %160 = vector.load %arg11[%c1_122, %c0_123, %c0_124] : memref<4x8x8xf32, #tpu.memory_space<vmem>>, vector<1x8x8xf32>
      %161 = vector.shape_cast %160 : vector<1x8x8xf32> to vector<8x8xf32>
      %162 = vector.shape_cast %159 : vector<8x8xf32> to vector<1x8x8xf32>
      tpu.vector_store %arg11[%c1_122, %c0_123, %c0_124], %162 {strides = array<i32>} : memref<4x8x8xf32, #tpu.memory_space<vmem>>, vector<1x8x8xf32>,
      %c1_125 = arith.constant 1 : index
      %c0_126 = arith.constant 0 : index
      %c0_127 = arith.constant 0 : index
      %163 = vector.load %arg6[%c1_125, %c0_126, %c0_127] : memref<4x32x8xf32, #tpu.memory_space<vmem>>, vector<1x32x8xf32>
      %164 = vector.shape_cast %163 : vector<1x32x8xf32> to vector<32x8xf32>
      %cst_128 = arith.constant dense<0.000000e+00> : vector<8x8xf32>
      %165 = tpu.matmul %138, %164, %cst_128 {dimension_numbers = #tpu.dot_dimension_numbers<[1], [0], [0], [1], [0, 0, 1, 1], [], []>} : vector<8x32xf32>, vector<32x8xf32>, vector<8x8xf32> -> vector<8x8xf32>
      %c1_129 = arith.constant 1 : index
      %c0_130 = arith.constant 0 : index
      %c0_131 = arith.constant 0 : index
      %166 = vector.load %arg12[%c1_129, %c0_130, %c0_131] : memref<4x8x8xf32, #tpu.memory_space<vmem>>, vector<1x8x8xf32>
      %167 = vector.shape_cast %166 : vector<1x8x8xf32> to vector<8x8xf32>
      %168 = vector.shape_cast %165 : vector<8x8xf32> to vector<1x8x8xf32>
      tpu.vector_store %arg12[%c1_129, %c0_130, %c0_131], %168 {strides = array<i32>} : memref<4x8x8xf32, #tpu.memory_space<vmem>>, vector<1x8x8xf32>,
      %c1_132 = arith.constant 1 : index
      %c0_133 = arith.constant 0 : index
      %c0_134 = arith.constant 0 : index
      %169 = vector.load %arg7[%c1_132, %c0_133, %c0_134] : memref<4x32x8xf32, #tpu.memory_space<vmem>>, vector<1x32x8xf32>
      %170 = vector.shape_cast %169 : vector<1x32x8xf32> to vector<32x8xf32>
      %cst_135 = arith.constant dense<0.000000e+00> : vector<8x8xf32>
      %171 = tpu.matmul %138, %170, %cst_135 {dimension_numbers = #tpu.dot_dimension_numbers<[1], [0], [0], [1], [0, 0, 1, 1], [], []>} : vector<8x32xf32>, vector<32x8xf32>, vector<8x8xf32> -> vector<8x8xf32>
      %c1_136 = arith.constant 1 : index
      %c0_137 = arith.constant 0 : index
      %c0_138 = arith.constant 0 : index
      %172 = vector.load %arg13[%c1_136, %c0_137, %c0_138] : memref<4x8x8xf32, #tpu.memory_space<vmem>>, vector<1x8x8xf32>
      %173 = vector.shape_cast %172 : vector<1x8x8xf32> to vector<8x8xf32>
      %174 = vector.shape_cast %171 : vector<8x8xf32> to vector<1x8x8xf32>
      tpu.vector_store %arg13[%c1_136, %c0_137, %c0_138], %174 {strides = array<i32>} : memref<4x8x8xf32, #tpu.memory_space<vmem>>, vector<1x8x8xf32>,
      %c2_139 = arith.constant 2 : index
      %c0_140 = arith.constant 0 : index
      %c0_141 = arith.constant 0 : index
      %175 = vector.load %arg5[%c2_139, %c0_140, %c0_141] : memref<4x32x8xf32, #tpu.memory_space<vmem>>, vector<1x32x8xf32>
      %176 = vector.shape_cast %175 : vector<1x32x8xf32> to vector<32x8xf32>
      %cst_142 = arith.constant dense<0.000000e+00> : vector<8x8xf32>
      %177 = tpu.matmul %138, %176, %cst_142 {dimension_numbers = #tpu.dot_dimension_numbers<[1], [0], [0], [1], [0, 0, 1, 1], [], []>} : vector<8x32xf32>, vector<32x8xf32>, vector<8x8xf32> -> vector<8x8xf32>
      %c2_143 = arith.constant 2 : index
      %c0_144 = arith.constant 0 : index
      %c0_145 = arith.constant 0 : index
      %178 = vector.load %arg11[%c2_143, %c0_144, %c0_145] : memref<4x8x8xf32, #tpu.memory_space<vmem>>, vector<1x8x8xf32>
      %179 = vector.shape_cast %178 : vector<1x8x8xf32> to vector<8x8xf32>
      %180 = vector.shape_cast %177 : vector<8x8xf32> to vector<1x8x8xf32>
      tpu.vector_store %arg11[%c2_143, %c0_144, %c0_145], %180 {strides = array<i32>} : memref<4x8x8xf32, #tpu.memory_space<vmem>>, vector<1x8x8xf32>,
      %c2_146 = arith.constant 2 : index
      %c0_147 = arith.constant 0 : index
      %c0_148 = arith.constant 0 : index
      %181 = vector.load %arg6[%c2_146, %c0_147, %c0_148] : memref<4x32x8xf32, #tpu.memory_space<vmem>>, vector<1x32x8xf32>
      %182 = vector.shape_cast %181 : vector<1x32x8xf32> to vector<32x8xf32>
      %cst_149 = arith.constant dense<0.000000e+00> : vector<8x8xf32>
      %183 = tpu.matmul %138, %182, %cst_149 {dimension_numbers = #tpu.dot_dimension_numbers<[1], [0], [0], [1], [0, 0, 1, 1], [], []>} : vector<8x32xf32>, vector<32x8xf32>, vector<8x8xf32> -> vector<8x8xf32>
      %c2_150 = arith.constant 2 : index
      %c0_151 = arith.constant 0 : index
      %c0_152 = arith.constant 0 : index
      %184 = vector.load %arg12[%c2_150, %c0_151, %c0_152] : memref<4x8x8xf32, #tpu.memory_space<vmem>>, vector<1x8x8xf32>
      %185 = vector.shape_cast %184 : vector<1x8x8xf32> to vector<8x8xf32>
      %186 = vector.shape_cast %183 : vector<8x8xf32> to vector<1x8x8xf32>
      tpu.vector_store %arg12[%c2_150, %c0_151, %c0_152], %186 {strides = array<i32>} : memref<4x8x8xf32, #tpu.memory_space<vmem>>, vector<1x8x8xf32>,
      %c2_153 = arith.constant 2 : index
      %c0_154 = arith.constant 0 : index
      %c0_155 = arith.constant 0 : index
      %187 = vector.load %arg7[%c2_153, %c0_154, %c0_155] : memref<4x32x8xf32, #tpu.memory_space<vmem>>, vector<1x32x8xf32>
      %188 = vector.shape_cast %187 : vector<1x32x8xf32> to vector<32x8xf32>
      %cst_156 = arith.constant dense<0.000000e+00> : vector<8x8xf32>
      %189 = tpu.matmul %138, %188, %cst_156 {dimension_numbers = #tpu.dot_dimension_numbers<[1], [0], [0], [1], [0, 0, 1, 1], [], []>} : vector<8x32xf32>, vector<32x8xf32>, vector<8x8xf32> -> vector<8x8xf32>
      %c2_157 = arith.constant 2 : index
      %c0_158 = arith.constant 0 : index
      %c0_159 = arith.constant 0 : index
      %190 = vector.load %arg13[%c2_157, %c0_158, %c0_159] : memref<4x8x8xf32, #tpu.memory_space<vmem>>, vector<1x8x8xf32>
      %191 = vector.shape_cast %190 : vector<1x8x8xf32> to vector<8x8xf32>
      %192 = vector.shape_cast %189 : vector<8x8xf32> to vector<1x8x8xf32>
      tpu.vector_store %arg13[%c2_157, %c0_158, %c0_159], %192 {strides = array<i32>} : memref<4x8x8xf32, #tpu.memory_space<vmem>>, vector<1x8x8xf32>,
      %c3_160 = arith.constant 3 : index
      %c0_161 = arith.constant 0 : index
      %c0_162 = arith.constant 0 : index
      %193 = vector.load %arg5[%c3_160, %c0_161, %c0_162] : memref<4x32x8xf32, #tpu.memory_space<vmem>>, vector<1x32x8xf32>
      %194 = vector.shape_cast %193 : vector<1x32x8xf32> to vector<32x8xf32>
      %cst_163 = arith.constant dense<0.000000e+00> : vector<8x8xf32>
      %195 = tpu.matmul %138, %194, %cst_163 {dimension_numbers = #tpu.dot_dimension_numbers<[1], [0], [0], [1], [0, 0, 1, 1], [], []>} : vector<8x32xf32>, vector<32x8xf32>, vector<8x8xf32> -> vector<8x8xf32>
      %c3_164 = arith.constant 3 : index
      %c0_165 = arith.constant 0 : index
      %c0_166 = arith.constant 0 : index
      %196 = vector.load %arg11[%c3_164, %c0_165, %c0_166] : memref<4x8x8xf32, #tpu.memory_space<vmem>>, vector<1x8x8xf32>
      %197 = vector.shape_cast %196 : vector<1x8x8xf32> to vector<8x8xf32>
      %198 = vector.shape_cast %195 : vector<8x8xf32> to vector<1x8x8xf32>
      tpu.vector_store %arg11[%c3_164, %c0_165, %c0_166], %198 {strides = array<i32>} : memref<4x8x8xf32, #tpu.memory_space<vmem>>, vector<1x8x8xf32>,
      %c3_167 = arith.constant 3 : index
      %c0_168 = arith.constant 0 : index
      %c0_169 = arith.constant 0 : index
      %199 = vector.load %arg6[%c3_167, %c0_168, %c0_169] : memref<4x32x8xf32, #tpu.memory_space<vmem>>, vector<1x32x8xf32>
      %200 = vector.shape_cast %199 : vector<1x32x8xf32> to vector<32x8xf32>
      %cst_170 = arith.constant dense<0.000000e+00> : vector<8x8xf32>
      %201 = tpu.matmul %138, %200, %cst_170 {dimension_numbers = #tpu.dot_dimension_numbers<[1], [0], [0], [1], [0, 0, 1, 1], [], []>} : vector<8x32xf32>, vector<32x8xf32>, vector<8x8xf32> -> vector<8x8xf32>
      %c3_171 = arith.constant 3 : index
      %c0_172 = arith.constant 0 : index
      %c0_173 = arith.constant 0 : index
      %202 = vector.load %arg12[%c3_171, %c0_172, %c0_173] : memref<4x8x8xf32, #tpu.memory_space<vmem>>, vector<1x8x8xf32>
      %203 = vector.shape_cast %202 : vector<1x8x8xf32> to vector<8x8xf32>
      %204 = vector.shape_cast %201 : vector<8x8xf32> to vector<1x8x8xf32>
      tpu.vector_store %arg12[%c3_171, %c0_172, %c0_173], %204 {strides = array<i32>} : memref<4x8x8xf32, #tpu.memory_space<vmem>>, vector<1x8x8xf32>,
      %c3_174 = arith.constant 3 : index
      %c0_175 = arith.constant 0 : index
      %c0_176 = arith.constant 0 : index
      %205 = vector.load %arg7[%c3_174, %c0_175, %c0_176] : memref<4x32x8xf32, #tpu.memory_space<vmem>>, vector<1x32x8xf32>
      %206 = vector.shape_cast %205 : vector<1x32x8xf32> to vector<32x8xf32>
      %cst_177 = arith.constant dense<0.000000e+00> : vector<8x8xf32>
      %207 = tpu.matmul %138, %206, %cst_177 {dimension_numbers = #tpu.dot_dimension_numbers<[1], [0], [0], [1], [0, 0, 1, 1], [], []>} : vector<8x32xf32>, vector<32x8xf32>, vector<8x8xf32> -> vector<8x8xf32>
      %c3_178 = arith.constant 3 : index
      %c0_179 = arith.constant 0 : index
      %c0_180 = arith.constant 0 : index
      %208 = vector.load %arg13[%c3_178, %c0_179, %c0_180] : memref<4x8x8xf32, #tpu.memory_space<vmem>>, vector<1x8x8xf32>
      %209 = vector.shape_cast %208 : vector<1x8x8xf32> to vector<8x8xf32>
      %210 = vector.shape_cast %207 : vector<8x8xf32> to vector<1x8x8xf32>
      tpu.vector_store %arg13[%c3_178, %c0_179, %c0_180], %210 {strides = array<i32>} : memref<4x8x8xf32, #tpu.memory_space<vmem>>, vector<1x8x8xf32>,
    } else {
    }
    %c8_i32 = arith.constant 8 : i32
    %3 = arith.muli %arg1, %c8_i32 : i32
    %4 = tpu.assume_multiple %3, 8 : i32
    %c0 = arith.constant 0 : index
    %c0_1 = arith.constant 0 : index
    %5 = vector.load %arg9[%c0, %c0_1] : memref<1x32xf32, #tpu.memory_space<vmem>>, vector<1x32xf32>
    %6 = vector.shape_cast %5 : vector<1x32xf32> to vector<1x32xf32>
    %7 = vector.broadcast %6 : vector<1x32xf32> to vector<8x32xf32>
    %c0_2 = arith.constant 0 : index
    %c0_3 = arith.constant 0 : index
    %8 = vector.load %arg14[%c0_2, %c0_3] : memref<8x32xf32, #tpu.memory_space<vmem>>, vector<8x32xf32>
    tpu.vector_store %arg14[%c0_2, %c0_3], %7 {strides = array<i32>} : memref<8x32xf32, #tpu.memory_space<vmem>>, vector<8x32xf32>,
    %c0_4 = arith.constant 0 : index
    %9 = arith.index_cast %4 : i32 to index
    %c0_5 = arith.constant 0 : index
    %10 = vector.load %arg11[%c0_4, %9, %c0_5] : memref<4x8x8xf32, #tpu.memory_space<vmem>>, vector<1x8x8xf32>
    %11 = vector.shape_cast %10 : vector<1x8x8xf32> to vector<8x8xf32>
    %c0_6 = arith.constant 0 : index
    %c0_7 = arith.constant 0 : index
    %c0_8 = arith.constant 0 : index
    %12 = vector.load %arg12[%c0_6, %c0_7, %c0_8] : memref<4x8x8xf32, #tpu.memory_space<vmem>>, vector<1x8x8xf32>
    %13 = vector.shape_cast %12 : vector<1x8x8xf32> to vector<8x8xf32>
    %c0_9 = arith.constant 0 : index
    %c0_10 = arith.constant 0 : index
    %c0_11 = arith.constant 0 : index
    %14 = vector.load %arg13[%c0_9, %c0_10, %c0_11] : memref<4x8x8xf32, #tpu.memory_space<vmem>>, vector<1x8x8xf32>
    %15 = vector.shape_cast %14 : vector<1x8x8xf32> to vector<8x8xf32>
    %cst = arith.constant dense<0.000000e+00> : vector<8x8xf32>
    %16 = tpu.matmul %11, %13, %cst {dimension_numbers = #tpu.dot_dimension_numbers<[1], [1], [0], [0], [0, 0, 1, 0], [], []>} : vector<8x8xf32>, vector<8x8xf32>, vector<8x8xf32> -> vector<8x8xf32>
    %cst_12 = arith.constant dense<0xFF800000> : vector<8xf32>
    %17 = vector.multi_reduction <maximumf>, %16, %cst_12 [1] : vector<8x8xf32> to vector<8xf32>
    %18 = vector.shape_cast %17 : vector<8xf32> to vector<8x1xf32>
    %19 = vector.broadcast %18 : vector<8x1xf32> to vector<8x8xf32>
    %20 = arith.subf %16, %19 : vector<8x8xf32>
    %21 = math.exp %20 : vector<8x8xf32>
    %cst_13 = arith.constant dense<0.000000e+00> : vector<8xf32>
    %22 = vector.multi_reduction <add>, %21, %cst_13 [1] : vector<8x8xf32> to vector<8xf32>
    %23 = vector.shape_cast %22 : vector<8xf32> to vector<8x1xf32>
    %cst_14 = arith.constant dense<0.000000e+00> : vector<8x8xf32>
    %24 = tpu.matmul %21, %15, %cst_14 {dimension_numbers = #tpu.dot_dimension_numbers<[1], [0], [0], [1], [0, 0, 1, 1], [], []>} : vector<8x8xf32>, vector<8x8xf32>, vector<8x8xf32> -> vector<8x8xf32>
    %25 = tpu.reciprocal %23 {approx = true} : vector<8x1xf32> -> vector<8x1xf32>
    %26 = vector.broadcast %25 : vector<8x1xf32> to vector<8x8xf32>
    %27 = arith.mulf %24, %26 : vector<8x8xf32>
    %c0_15 = arith.constant 0 : index
    %c0_16 = arith.constant 0 : index
    %28 = vector.load %arg14[%c0_15, %c0_16] : memref<8x32xf32, #tpu.memory_space<vmem>>, vector<8x32xf32>
    %c0_17 = arith.constant 0 : index
    %c0_18 = arith.constant 0 : index
    %c0_19 = arith.constant 0 : index
    %29 = vector.load %arg8[%c0_17, %c0_18, %c0_19] : memref<4x8x32xf32, #tpu.memory_space<vmem>>, vector<1x8x32xf32>
    %30 = vector.shape_cast %29 : vector<1x8x32xf32> to vector<8x32xf32>
    %cst_20 = arith.constant dense<0.000000e+00> : vector<8x32xf32>
    %31 = tpu.matmul %27, %30, %cst_20 {dimension_numbers = #tpu.dot_dimension_numbers<[1], [0], [0], [1], [0, 0, 1, 1], [], []>} : vector<8x8xf32>, vector<8x32xf32>, vector<8x32xf32> -> vector<8x32xf32>
    %32 = arith.addf %28, %31 : vector<8x32xf32>
    %c0_21 = arith.constant 0 : index
    %c0_22 = arith.constant 0 : index
    %33 = vector.load %arg14[%c0_21, %c0_22] : memref<8x32xf32, #tpu.memory_space<vmem>>, vector<8x32xf32>
    tpu.vector_store %arg14[%c0_21, %c0_22], %32 {strides = array<i32>} : memref<8x32xf32, #tpu.memory_space<vmem>>, vector<8x32xf32>,
    %c1 = arith.constant 1 : index
    %34 = arith.index_cast %4 : i32 to index
    %c0_23 = arith.constant 0 : index
    %35 = vector.load %arg11[%c1, %34, %c0_23] : memref<4x8x8xf32, #tpu.memory_space<vmem>>, vector<1x8x8xf32>
    %36 = vector.shape_cast %35 : vector<1x8x8xf32> to vector<8x8xf32>
    %c1_24 = arith.constant 1 : index
    %c0_25 = arith.constant 0 : index
    %c0_26 = arith.constant 0 : index
    %37 = vector.load %arg12[%c1_24, %c0_25, %c0_26] : memref<4x8x8xf32, #tpu.memory_space<vmem>>, vector<1x8x8xf32>
    %38 = vector.shape_cast %37 : vector<1x8x8xf32> to vector<8x8xf32>
    %c1_27 = arith.constant 1 : index
    %c0_28 = arith.constant 0 : index
    %c0_29 = arith.constant 0 : index
    %39 = vector.load %arg13[%c1_27, %c0_28, %c0_29] : memref<4x8x8xf32, #tpu.memory_space<vmem>>, vector<1x8x8xf32>
    %40 = vector.shape_cast %39 : vector<1x8x8xf32> to vector<8x8xf32>
    %cst_30 = arith.constant dense<0.000000e+00> : vector<8x8xf32>
    %41 = tpu.matmul %36, %38, %cst_30 {dimension_numbers = #tpu.dot_dimension_numbers<[1], [1], [0], [0], [0, 0, 1, 0], [], []>} : vector<8x8xf32>, vector<8x8xf32>, vector<8x8xf32> -> vector<8x8xf32>
    %cst_31 = arith.constant dense<0xFF800000> : vector<8xf32>
    %42 = vector.multi_reduction <maximumf>, %41, %cst_31 [1] : vector<8x8xf32> to vector<8xf32>
    %43 = vector.shape_cast %42 : vector<8xf32> to vector<8x1xf32>
    %44 = vector.broadcast %43 : vector<8x1xf32> to vector<8x8xf32>
    %45 = arith.subf %41, %44 : vector<8x8xf32>
    %46 = math.exp %45 : vector<8x8xf32>
    %cst_32 = arith.constant dense<0.000000e+00> : vector<8xf32>
    %47 = vector.multi_reduction <add>, %46, %cst_32 [1] : vector<8x8xf32> to vector<8xf32>
    %48 = vector.shape_cast %47 : vector<8xf32> to vector<8x1xf32>
    %cst_33 = arith.constant dense<0.000000e+00> : vector<8x8xf32>
    %49 = tpu.matmul %46, %40, %cst_33 {dimension_numbers = #tpu.dot_dimension_numbers<[1], [0], [0], [1], [0, 0, 1, 1], [], []>} : vector<8x8xf32>, vector<8x8xf32>, vector<8x8xf32> -> vector<8x8xf32>
    %50 = tpu.reciprocal %48 {approx = true} : vector<8x1xf32> -> vector<8x1xf32>
    %51 = vector.broadcast %50 : vector<8x1xf32> to vector<8x8xf32>
    %52 = arith.mulf %49, %51 : vector<8x8xf32>
    %c0_34 = arith.constant 0 : index
    %c0_35 = arith.constant 0 : index
    %53 = vector.load %arg14[%c0_34, %c0_35] : memref<8x32xf32, #tpu.memory_space<vmem>>, vector<8x32xf32>
    %c1_36 = arith.constant 1 : index
    %c0_37 = arith.constant 0 : index
    %c0_38 = arith.constant 0 : index
    %54 = vector.load %arg8[%c1_36, %c0_37, %c0_38] : memref<4x8x32xf32, #tpu.memory_space<vmem>>, vector<1x8x32xf32>
    %55 = vector.shape_cast %54 : vector<1x8x32xf32> to vector<8x32xf32>
    %cst_39 = arith.constant dense<0.000000e+00> : vector<8x32xf32>
    %56 = tpu.matmul %52, %55, %cst_39 {dimension_numbers = #tpu.dot_dimension_numbers<[1], [0], [0], [1], [0, 0, 1, 1], [], []>} : vector<8x8xf32>, vector<8x32xf32>, vector<8x32xf32> -> vector<8x32xf32>
    %57 = arith.addf %53, %56 : vector<8x32xf32>
    %c0_40 = arith.constant 0 : index
    %c0_41 = arith.constant 0 : index
    %58 = vector.load %arg14[%c0_40, %c0_41] : memref<8x32xf32, #tpu.memory_space<vmem>>, vector<8x32xf32>
    tpu.vector_store %arg14[%c0_40, %c0_41], %57 {strides = array<i32>} : memref<8x32xf32, #tpu.memory_space<vmem>>, vector<8x32xf32>,
    %c2 = arith.constant 2 : index
    %59 = arith.index_cast %4 : i32 to index
    %c0_42 = arith.constant 0 : index
    %60 = vector.load %arg11[%c2, %59, %c0_42] : memref<4x8x8xf32, #tpu.memory_space<vmem>>, vector<1x8x8xf32>
    %61 = vector.shape_cast %60 : vector<1x8x8xf32> to vector<8x8xf32>
    %c2_43 = arith.constant 2 : index
    %c0_44 = arith.constant 0 : index
    %c0_45 = arith.constant 0 : index
    %62 = vector.load %arg12[%c2_43, %c0_44, %c0_45] : memref<4x8x8xf32, #tpu.memory_space<vmem>>, vector<1x8x8xf32>
    %63 = vector.shape_cast %62 : vector<1x8x8xf32> to vector<8x8xf32>
    %c2_46 = arith.constant 2 : index
    %c0_47 = arith.constant 0 : index
    %c0_48 = arith.constant 0 : index
    %64 = vector.load %arg13[%c2_46, %c0_47, %c0_48] : memref<4x8x8xf32, #tpu.memory_space<vmem>>, vector<1x8x8xf32>
    %65 = vector.shape_cast %64 : vector<1x8x8xf32> to vector<8x8xf32>
    %cst_49 = arith.constant dense<0.000000e+00> : vector<8x8xf32>
    %66 = tpu.matmul %61, %63, %cst_49 {dimension_numbers = #tpu.dot_dimension_numbers<[1], [1], [0], [0], [0, 0, 1, 0], [], []>} : vector<8x8xf32>, vector<8x8xf32>, vector<8x8xf32> -> vector<8x8xf32>
    %cst_50 = arith.constant dense<0xFF800000> : vector<8xf32>
    %67 = vector.multi_reduction <maximumf>, %66, %cst_50 [1] : vector<8x8xf32> to vector<8xf32>
    %68 = vector.shape_cast %67 : vector<8xf32> to vector<8x1xf32>
    %69 = vector.broadcast %68 : vector<8x1xf32> to vector<8x8xf32>
    %70 = arith.subf %66, %69 : vector<8x8xf32>
    %71 = math.exp %70 : vector<8x8xf32>
    %cst_51 = arith.constant dense<0.000000e+00> : vector<8xf32>
    %72 = vector.multi_reduction <add>, %71, %cst_51 [1] : vector<8x8xf32> to vector<8xf32>
    %73 = vector.shape_cast %72 : vector<8xf32> to vector<8x1xf32>
    %cst_52 = arith.constant dense<0.000000e+00> : vector<8x8xf32>
    %74 = tpu.matmul %71, %65, %cst_52 {dimension_numbers = #tpu.dot_dimension_numbers<[1], [0], [0], [1], [0, 0, 1, 1], [], []>} : vector<8x8xf32>, vector<8x8xf32>, vector<8x8xf32> -> vector<8x8xf32>
    %75 = tpu.reciprocal %73 {approx = true} : vector<8x1xf32> -> vector<8x1xf32>
    %76 = vector.broadcast %75 : vector<8x1xf32> to vector<8x8xf32>
    %77 = arith.mulf %74, %76 : vector<8x8xf32>
    %c0_53 = arith.constant 0 : index
    %c0_54 = arith.constant 0 : index
    %78 = vector.load %arg14[%c0_53, %c0_54] : memref<8x32xf32, #tpu.memory_space<vmem>>, vector<8x32xf32>
    %c2_55 = arith.constant 2 : index
    %c0_56 = arith.constant 0 : index
    %c0_57 = arith.constant 0 : index
    %79 = vector.load %arg8[%c2_55, %c0_56, %c0_57] : memref<4x8x32xf32, #tpu.memory_space<vmem>>, vector<1x8x32xf32>
    %80 = vector.shape_cast %79 : vector<1x8x32xf32> to vector<8x32xf32>
    %cst_58 = arith.constant dense<0.000000e+00> : vector<8x32xf32>
    %81 = tpu.matmul %77, %80, %cst_58 {dimension_numbers = #tpu.dot_dimension_numbers<[1], [0], [0], [1], [0, 0, 1, 1], [], []>} : vector<8x8xf32>, vector<8x32xf32>, vector<8x32xf32> -> vector<8x32xf32>
    %82 = arith.addf %78, %81 : vector<8x32xf32>
    %c0_59 = arith.constant 0 : index
    %c0_60 = arith.constant 0 : index
    %83 = vector.load %arg14[%c0_59, %c0_60] : memref<8x32xf32, #tpu.memory_space<vmem>>, vector<8x32xf32>
    tpu.vector_store %arg14[%c0_59, %c0_60], %82 {strides = array<i32>} : memref<8x32xf32, #tpu.memory_space<vmem>>, vector<8x32xf32>,
    %c3 = arith.constant 3 : index
    %84 = arith.index_cast %4 : i32 to index
    %c0_61 = arith.constant 0 : index
    %85 = vector.load %arg11[%c3, %84, %c0_61] : memref<4x8x8xf32, #tpu.memory_space<vmem>>, vector<1x8x8xf32>
    %86 = vector.shape_cast %85 : vector<1x8x8xf32> to vector<8x8xf32>
    %c3_62 = arith.constant 3 : index
    %c0_63 = arith.constant 0 : index
    %c0_64 = arith.constant 0 : index
    %87 = vector.load %arg12[%c3_62, %c0_63, %c0_64] : memref<4x8x8xf32, #tpu.memory_space<vmem>>, vector<1x8x8xf32>
    %88 = vector.shape_cast %87 : vector<1x8x8xf32> to vector<8x8xf32>
    %c3_65 = arith.constant 3 : index
    %c0_66 = arith.constant 0 : index
    %c0_67 = arith.constant 0 : index
    %89 = vector.load %arg13[%c3_65, %c0_66, %c0_67] : memref<4x8x8xf32, #tpu.memory_space<vmem>>, vector<1x8x8xf32>
    %90 = vector.shape_cast %89 : vector<1x8x8xf32> to vector<8x8xf32>
    %cst_68 = arith.constant dense<0.000000e+00> : vector<8x8xf32>
    %91 = tpu.matmul %86, %88, %cst_68 {dimension_numbers = #tpu.dot_dimension_numbers<[1], [1], [0], [0], [0, 0, 1, 0], [], []>} : vector<8x8xf32>, vector<8x8xf32>, vector<8x8xf32> -> vector<8x8xf32>
    %cst_69 = arith.constant dense<0xFF800000> : vector<8xf32>
    %92 = vector.multi_reduction <maximumf>, %91, %cst_69 [1] : vector<8x8xf32> to vector<8xf32>
    %93 = vector.shape_cast %92 : vector<8xf32> to vector<8x1xf32>
    %94 = vector.broadcast %93 : vector<8x1xf32> to vector<8x8xf32>
    %95 = arith.subf %91, %94 : vector<8x8xf32>
    %96 = math.exp %95 : vector<8x8xf32>
    %cst_70 = arith.constant dense<0.000000e+00> : vector<8xf32>
    %97 = vector.multi_reduction <add>, %96, %cst_70 [1] : vector<8x8xf32> to vector<8xf32>
    %98 = vector.shape_cast %97 : vector<8xf32> to vector<8x1xf32>
    %cst_71 = arith.constant dense<0.000000e+00> : vector<8x8xf32>
    %99 = tpu.matmul %96, %90, %cst_71 {dimension_numbers = #tpu.dot_dimension_numbers<[1], [0], [0], [1], [0, 0, 1, 1], [], []>} : vector<8x8xf32>, vector<8x8xf32>, vector<8x8xf32> -> vector<8x8xf32>
    %100 = tpu.reciprocal %98 {approx = true} : vector<8x1xf32> -> vector<8x1xf32>
    %101 = vector.broadcast %100 : vector<8x1xf32> to vector<8x8xf32>
    %102 = arith.mulf %99, %101 : vector<8x8xf32>
    %c0_72 = arith.constant 0 : index
    %c0_73 = arith.constant 0 : index
    %103 = vector.load %arg14[%c0_72, %c0_73] : memref<8x32xf32, #tpu.memory_space<vmem>>, vector<8x32xf32>
    %c3_74 = arith.constant 3 : index
    %c0_75 = arith.constant 0 : index
    %c0_76 = arith.constant 0 : index
    %104 = vector.load %arg8[%c3_74, %c0_75, %c0_76] : memref<4x8x32xf32, #tpu.memory_space<vmem>>, vector<1x8x32xf32>
    %105 = vector.shape_cast %104 : vector<1x8x32xf32> to vector<8x32xf32>
    %cst_77 = arith.constant dense<0.000000e+00> : vector<8x32xf32>
    %106 = tpu.matmul %102, %105, %cst_77 {dimension_numbers = #tpu.dot_dimension_numbers<[1], [0], [0], [1], [0, 0, 1, 1], [], []>} : vector<8x8xf32>, vector<8x32xf32>, vector<8x32xf32> -> vector<8x32xf32>
    %107 = arith.addf %103, %106 : vector<8x32xf32>
    %c0_78 = arith.constant 0 : index
    %c0_79 = arith.constant 0 : index
    %108 = vector.load %arg14[%c0_78, %c0_79] : memref<8x32xf32, #tpu.memory_space<vmem>>, vector<8x32xf32>
    tpu.vector_store %arg14[%c0_78, %c0_79], %107 {strides = array<i32>} : memref<8x32xf32, #tpu.memory_space<vmem>>, vector<8x32xf32>,
    %c0_80 = arith.constant 0 : index
    %c0_81 = arith.constant 0 : index
    %109 = vector.load %arg14[%c0_80, %c0_81] : memref<8x32xf32, #tpu.memory_space<vmem>>, vector<8x32xf32>
    %c0_82 = arith.constant 0 : index
    %c0_83 = arith.constant 0 : index
    %c0_84 = arith.constant 0 : index
    %110 = vector.load %arg10[%c0_82, %c0_83, %c0_84] : memref<1x8x32xf32, #tpu.memory_space<vmem>>, vector<1x8x32xf32>
    %111 = vector.shape_cast %110 : vector<1x8x32xf32> to vector<8x32xf32>
    %112 = vector.shape_cast %109 : vector<8x32xf32> to vector<1x8x32xf32>
    tpu.vector_store %arg10[%c0_82, %c0_83, %c0_84], %112 {strides = array<i32>} : memref<1x8x32xf32, #tpu.memory_space<vmem>>, vector<1x8x32xf32>,
    return
  }
  func.func @transform_0(%arg0: i32, %arg1: i32) -> (i32, i32, i32) {
    %c0_i32 = arith.constant 0 : i32
    %c0_i32_0 = arith.constant 0 : i32
    %c0_i32_1 = arith.constant 0 : i32
    return %arg0, %c0_i32, %c0_i32_0 : i32, i32, i32
  }
  func.func @transform_1(%arg0: i32, %arg1: i32) -> (i32, i32) {
    %c0_i32 = arith.constant 0 : i32
    %c0_i32_0 = arith.constant 0 : i32
    %c0_i32_1 = arith.constant 0 : i32
    return %c0_i32, %c0_i32_0 : i32, i32
  }
  func.func @transform_2(%arg0: i32, %arg1: i32) -> (i32, i32) {
    %c0_i32 = arith.constant 0 : i32
    %c0_i32_0 = arith.constant 0 : i32
    %c0_i32_1 = arith.constant 0 : i32
    return %c0_i32, %c0_i32_0 : i32, i32
  }
  func.func @transform_3(%arg0: i32, %arg1: i32) -> (i32, i32, i32) {
    %c0_i32 = arith.constant 0 : i32
    %c0_i32_0 = arith.constant 0 : i32
    %c0_i32_1 = arith.constant 0 : i32
    %c0_i32_2 = arith.constant 0 : i32
    return %c0_i32, %c0_i32_0, %c0_i32_1 : i32, i32, i32
  }
  func.func @transform_4(%arg0: i32, %arg1: i32) -> (i32, i32, i32) {
    %c0_i32 = arith.constant 0 : i32
    %c0_i32_0 = arith.constant 0 : i32
    %c0_i32_1 = arith.constant 0 : i32
    %c0_i32_2 = arith.constant 0 : i32
    return %c0_i32, %c0_i32_0, %c0_i32_1 : i32, i32, i32
  }
  func.func @transform_5(%arg0: i32, %arg1: i32) -> (i32, i32, i32) {
    %c0_i32 = arith.constant 0 : i32
    %c0_i32_0 = arith.constant 0 : i32
    %c0_i32_1 = arith.constant 0 : i32
    %c0_i32_2 = arith.constant 0 : i32
    return %c0_i32, %c0_i32_0, %c0_i32_1 : i32, i32, i32
  }
  func.func @transform_6(%arg0: i32, %arg1: i32) -> (i32, i32, i32) {
    %c0_i32 = arith.constant 0 : i32
    %c0_i32_0 = arith.constant 0 : i32
    %c0_i32_1 = arith.constant 0 : i32
    %c0_i32_2 = arith.constant 0 : i32
    return %c0_i32, %c0_i32_0, %c0_i32_1 : i32, i32, i32
  }
  func.func @transform_7(%arg0: i32, %arg1: i32) -> (i32, i32) {
    %c0_i32 = arith.constant 0 : i32
    %c0_i32_0 = arith.constant 0 : i32
    %c0_i32_1 = arith.constant 0 : i32
    return %c0_i32, %c0_i32_0 : i32, i32
  }
  func.func @transform_8(%arg0: i32, %arg1: i32) -> (i32, i32, i32) {
    %c0_i32 = arith.constant 0 : i32
    %c0_i32_0 = arith.constant 0 : i32
    return %arg0, %arg1, %c0_i32 : i32, i32, i32
  }
}

</mosaic_0001>

<bundles_post_ra>
// kernel: tpu_custom_call.1
= control target key start
LH: loop header
LB: loop body
LE: loop exit
PB: predicated region body
PF: predicated region fallthrough
CT: control target
= control target key end

     0   :  { %s1773_s0 = inlined_call_operand.vmem [shape: f32[2,8,32], index: 0, kind: input, shape index: {}]   ;;  %s1774_s1 = inlined_call_operand.vmem [shape: f32[1,32], index: 1, kind: input, shape index: {}]   ;;  %s1775_s2 = inlined_call_operand.vmem [shape: f32[1,32], index: 2, kind: input, shape index: {}]   ;;  %s1776_s3 = inlined_call_operand.vmem [shape: f32[4,32,8], index: 3, kind: input, shape index: {}]   ;;  %s1777_s4 = inlined_call_operand.vmem [shape: f32[4,32,8], index: 4, kind: input, shape index: {}]   ;;  %s1778_s5 = inlined_call_operand.vmem [shape: f32[4,32,8], index: 5, kind: input, shape index: {}]   ;;  %s1779_s6 = inlined_call_operand.vmem [shape: f32[4,8,32], index: 6, kind: input, shape index: {}]   ;;  %s1780_s7 = inlined_call_operand.vmem [shape: f32[1,32], index: 7, kind: input, shape index: {}]   ;;  %s1781_s8 = inlined_call_operand.hbm [shape: f32[2,8,32], index: 8, kind: output, shape index: {}]  }
   0x1   :  { %1782 = sst [smem:[#allocation9_spill]] %s1773_s0 }
   0x2   :  { %13 = vsyncpa [#allocation7], 0 }
   0x3   :  { %15 = vsyncpa [#allocation7 + $0x1], 0  ;;  %s1450_s27 = smov 0   ;;  %s1452_s28 = smov 0  }
   0x4   :  { %s1454_s29 = smov 0   ;;  %s1456_s30 = smov 0  }
   0x5   :  { %s1458_s9 = smov 0   ;;  %s1460_s10 = smov 0  }
   0x6 LB: > { %s1164_s11 = sadd.s32 4294967295, %s1402_s10   ;;  %s1165_s12 = sadd.s32 4294967294, %s1402_s10   ;;  %s1402_s10 = sphi %s1460_s10, %s21_s10   ;;  %s1398_s9 = sphi %s1458_s9, %s1790_s9   ;;  %s1394_s30 = sphi %s1456_s30, %s1789_s30   ;;  %s1390_s29 = sphi %s1454_s29, %s1788_s29   ;;  %s1386_s28 = sphi %s1452_s28, %s1787_s28   ;;  %s1382_s27 = sphi %s1450_s27, %s1786_s27  }
   0x7   : > { %s33_s13 = sadd.s32 1, %s1398_s9  ;;  %s215_s14 = sadd.s32 1, %s1390_s29 }
   0x8   : > { %p35_p0 = scmp.ge.s32.totalorder %s33_s13, 2  ;;  %p225_p1 = scmp.ne.s32.totalorder %s1390_s29, %s1386_s28 }
   0x9   : > { %p226_p2 = scmp.eq.s32.totalorder %s1164_s11, 1  ;;  %p231_p3 = scmp.ne.s32.totalorder %s1386_s28, %s1382_s27 }
   0xa   : > { %s1792_s13 = smov (%p35_p0, %s33_s13), 0  ;;  %p232_p5 = scmp.eq.s32.totalorder %s1165_s12, 1 }
   0xb   : > { %p1490_p4 = por %p226_p2, %p225_p1  ;;  %s210_s16 = ssub.s32 %s1398_s9, %s1792_s13 }
   0xc   : > { %p1168_p6 = scmp.ge.s32.totalorder %s1402_s10, 1  ;;  %p213_p7 = scmp.eq.s32.totalorder %s210_s16, 0 }
   0xd   : > { %p1497_p8 = por %p232_p5, %p231_p3  ;;  %p278_p9 = scmp.lt.s32.totalorder %s1402_s10, 3 }
   0xe   : > { %s1503_s18 = scalar_select %p213_p7, %s1390_s29, %s215_s14  }
   0xf   : > { %p279_p10 = pnand %p1168_p6, %p278_p9 }
  0x10   : > { %p311_p11 = scmp.lt.s32.totalorder (!%p279_p10), %s1394_s30, 1  ;;  %s1785_s0 = sld [smem:[#allocation9_spill]] (!%p279_p10) }
  0x11   : > { %282 = sbr.rel (%p279_p10) target bundleno = 1370 (0x55a), region = 52  ;;  %s308_s26 = sand.u32 (!%p279_p10), 1, %s1386_s28  }
  0x12   : > { %s1169_s11 = sshll.u32 (!%p279_p10), %s308_s26, 3  ;;  %s1242_s12 = sshll.u32 (!%p279_p10), %s1394_s30, 3 }
  0x16   : > { %s312_s19 = scalar_select %p311_p11, %s1394_s30, 1  ;;  %vm320_vm0 = vcmask 261120   ;;  %v1404_v2 = vmov 32.0   ;;  %v363_v14 = vld [vmem:[%s1776_s3 + $0x18] sm:$0xff]  ;;  %v362_v18 = vld [vmem:[%s1776_s3 + $0x10] sm:$0xff]  ;;  %v361_v22 = vld [vmem:[%s1776_s3 + $0x8] sm:$0xff] }
  0x17   : > { %1304 = vrcp.f32 %v1404_v2  ;;  %v392_v15 = vld [vmem:[%s1777_s4 + $0x18] sm:$0xff]  ;;  %379 = vmatpush.msra.mxu0 %v363_v14  ;;  %v391_v19 = vld [vmem:[%s1777_s4 + $0x10] sm:$0xff]  ;;  %v390_v23 = vld [vmem:[%s1777_s4 + $0x8] sm:$0xff]  ;;  %vm387_vm5 = vcmask 64512  }
  0x18   : > { %s1170_s20 = sshll.u32 %s312_s19, 3  ;;  %v417_v16 = vld [vmem:[%s1778_s5 + $0x18] sm:$0xff]  ;;  %405 = vmatpush.msra.mxu1 %v392_v15  ;;  %v416_v20 = vld [vmem:[%s1778_s5 + $0x10] sm:$0xff]  ;;  %v415_v24 = vld [vmem:[%s1778_s5 + $0x8] sm:$0xff]  ;;  %s1080_s19 = scalar_lea.hbm %s1781_s8, %s1242_s12 }
  0x19   : > { %s314_s23 = scalar_lea.vmem %s1785_s0, %s1170_s20  ;;  %v1177_v17 = vld [vmem:[%s1776_s3 + $0x38] sm:$0xff]  ;;  %430 = vmatpush.msra.mxu2 %v417_v16  ;;  %380 = vmatpush.msra.mxu0 %v362_v18  ;;  %v1176_v21 = vld [vmem:[%s1776_s3 + $0x30] sm:$0xff]  ;;  %v1175_v25 = vld [vmem:[%s1776_s3 + $0x28] sm:$0xff]  ;;  %s310_s20 = scalar_lea.vmem [#allocation6], %s1169_s11 }
  0x1a   : > { %v319_v0 = vld [vmem:[%s314_s23] sm:$0xff]  ;;  %456 = vmatpush.msra.mxu3 %v1177_v17  ;;  %406 = vmatpush.msra.mxu1 %v391_v19  ;;  %v1182_v30 = vld [vmem:[%s1777_s4 + $0x38] sm:$0xff]  ;;  %v1181_v34 = vld [vmem:[%s1777_s4 + $0x30] sm:$0xff]  ;;  %s1082_s21 = sshll.u32 %s310_s20, 4  ;;  %s1084_s22 = sshll.u32 %s1080_s19, 4  ;;  %s1083_s21 = int_to_ptr.vmem [resolvable:$true] %s1082_s21  ;;  %s1085_s22 = int_to_ptr.hbm [resolvable:$true] %s1084_s22 }
  0x1b   : > { %v321_v1 = vsel %vm320_vm0, %v319_v0, 0.0  ;;  %431 = vmatpush.msra.mxu2 %v416_v20  ;;  %381 = vmatpush.msra.mxu0 %v361_v22  ;;  %v360_v26 = vld [vmem:[%s1776_s3] sm:$0xff]  ;;  %v1187_v31 = vld [vmem:[%s1778_s5 + $0x38] sm:$0xff]  ;;  %v1186_v35 = vld [vmem:[%s1778_s5 + $0x30] sm:$0xff]  ;;  %s1069_s23 = scalar_lea.sflag [#allocation7], %s308_s26  ;;  %s1338_s24 = sshra.s32 %s1085_s22, 4  ;;  %s1339_s24 = int_to_ptr.hbm [resolvable:$true] %s1338_s24 }
  0x1c   : > { %322 = vadd.xlane.f32.xlu0 %v321_v1  ;;  %457 = vmatpush.msra.mxu3 %v1176_v21  ;;  %v389_v27 = vld [vmem:[%s1777_s4] sm:$0xff]  ;;  %v1192_v32 = vld [vmem:[%s1776_s3 + $0x58] sm:$0xff]  ;;  %v1191_v37 = vld [vmem:[%s1776_s3 + $0x50] sm:$0xff]  ;;  %s1340_s30 = scalar_lea.hbm %s1339_s24, 8  ;;  %s1344_s12 = scalar_lea.hbm %s1781_s8, 16 }
  0x1d   : > { %v1305_v3 = vpop.eup %1304  ;;  %407 = vmatpush.msra.mxu1 %v390_v23  ;;  %432 = vmatpush.msra.mxu2 %v415_v24  ;;  %v414_v28 = vld [vmem:[%s1778_s5] sm:$0xff]  ;;  %v1197_v33 = vld [vmem:[%s1777_s4 + $0x58] sm:$0xff]  ;;  %v1196_v38 = vld [vmem:[%s1777_s4 + $0x50] sm:$0xff]  ;;  %p1341_p12 = scmp.ne.s32.totalorder %s1339_s24, %s1340_s30  ;;  %p1345_p1 = scmp.lt.s32.totalorder %s1339_s24, %s1781_s8 }
  0x1e   : > { %v325_v4 = vmul.f32 32.0, %v1305_v3  ;;  %vm329_vm1 = vweird.f32 %v1305_v3  ;;  %458 = vmatpush.msra.mxu3 %v1175_v25  ;;  %382 = vmatpush.msra.mxu0 %v360_v26  ;;  %v1174_v29 = vld [vmem:[%s1776_s3 + $0x20] sm:$0xff]  ;;  %v1180_v39 = vld [vmem:[%s1777_s4 + $0x28] sm:$0xff]  ;;  %v1202_v61 = vld [vmem:[%s1778_s5 + $0x58] sm:$0xff]  ;;  %p1346_p2 = scmp.lt.s32.totalorder %s1344_s12, %s1340_s30 }
  0x1f   : > { %408 = vmatpush.msra.mxu1 %v389_v27  ;;  %433 = vmatpush.msra.mxu2 %v414_v28  ;;  %v1185_v41 = vld [vmem:[%s1778_s5 + $0x28] sm:$0xff]  ;;  %v1179_v44 = vld [vmem:[%s1777_s4 + $0x20] sm:$0xff]  ;;  %v1207_v62 = vld [vmem:[%s1776_s3 + $0x78] sm:$0xff]  ;;  %p1342_p13 = pnand %p1341_p12, %p1490_p4 }
  0x20   : > { %v326_v5 = vsub.f32 1.0, %v325_v4  ;;  %459 = vmatpush.msra.mxu3 %v1174_v29  ;;  %483 = vmatpush.msrb.mxu0 %v1182_v30  ;;  %v1190_v42 = vld [vmem:[%s1776_s3 + $0x48] sm:$0xff]  ;;  %v1184_v45 = vld [vmem:[%s1778_s5 + $0x20] sm:$0xff]  ;;  %v1212_v63 = vld [vmem:[%s1777_s4 + $0x78] sm:$0xff]  ;;  %p1347_p3 = por %p1346_p2, %p1345_p1 }
  0x21   : > { %510 = vmatpush.msrb.mxu1 %v1187_v31  ;;  %537 = vmatpush.msrb.mxu2 %v1192_v32  ;;  %v1195_v43 = vld [vmem:[%s1777_s4 + $0x48] sm:$0xff]  ;;  %v1189_v47 = vld [vmem:[%s1776_s3 + $0x40] sm:$0xff]  ;;  %v1201_v1 = vld [vmem:[%s1778_s5 + $0x50] sm:$0xff]  ;;  %p1343_p0 = pneg %p1342_p13 }
  0x22   : > { %v327_v6 = vmul.f32 %v1305_v3, %v326_v5  ;;  %564 = vmatpush.msrb.mxu3 %v1197_v33  ;;  %484 = vmatpush.msrb.mxu0 %v1181_v34  ;;  %v1194_v48 = vld [vmem:[%s1777_s4 + $0x40] sm:$0xff]  ;;  %v1206_v2 = vld [vmem:[%s1776_s3 + $0x70] sm:$0xff]  ;;  %v1200_v5 = vld [vmem:[%s1778_s5 + $0x48] sm:$0xff] }
  0x23   : > { %511 = vmatpush.msrb.mxu1 %v1186_v35  ;;  %538 = vmatpush.msrb.mxu2 %v1191_v37  ;;  %v1301_v55 = vld [vmem:[%s1774_s1] ss:$0 sm:$0xff]  ;;  %v1216_v4 = vld [vmem:[%s1778_s5 + $0x70] sm:$0xff]  ;;  %p1348_p5 = pnand %p1347_p3, %p1343_p0 }
  0x24   : > { %v328_v7 = vadd.f32 %v1305_v3, %v327_v6  ;;  %565 = vmatpush.msrb.mxu3 %v1196_v38  ;;  %485 = vmatpush.msrb.mxu0 %v1180_v39  ;;  %v1302_v57 = vld [vmem:[%s1775_s2] ss:$0 sm:$0xff]  ;;  %v1205_v6 = vld [vmem:[%s1776_s3 + $0x68] sm:$0xff] }
  0x25   : > { %512 = vmatpush.msrb.mxu1 %v1185_v41  ;;  %539 = vmatpush.msrb.mxu2 %v1190_v42  ;;  %v1227_v38 = vld [vmem:[%s1779_s6 + $0x8] sm:$0xff] }
  0x26   : > { %v330_v8 = vsel %vm329_vm1, %v1305_v3, %v328_v7  ;;  %566 = vmatpush.msrb.mxu3 %v1195_v43  ;;  %486 = vmatpush.msrb.mxu0 %v1179_v44  ;;  %v1211_v3 = vld [vmem:[%s1777_s4 + $0x70] sm:$0xff]  ;;  %v1210_v7 = vld [vmem:[%s1777_s4 + $0x68] sm:$0xff] }
  0x27   : > { %513 = vmatpush.msrb.mxu1 %v1184_v45  ;;  %540 = vmatpush.msrb.mxu2 %v1189_v47 }
  0x28   : > { %567 = vmatpush.msrb.mxu3 %v1194_v48 }
  0x8f   : > { %v323_v9 = vpop.xlane.xlu0 %322 }
  0x90   : > { %v331_v10 = vmul.f32 %v330_v8, %v323_v9  ;;  %v1199_v9 = vld [vmem:[%s1778_s5 + $0x40] sm:$0xff] }
  0x92   : > { %v1511_v11 = vsub.f32 %v319_v0, %v331_v10  ;;  %v1217_v0 = vld [vmem:[%s1778_s5 + $0x78] sm:$0xff]  ;;  %v1204_v10 = vld [vmem:[%s1776_s3 + $0x60] sm:$0xff] }
  0x94   : > { %v333_v12 = vmul.f32 %v1511_v11, %v1511_v11 }
  0x96   : > { %v334_v13 = vsel %vm320_vm0, %v333_v12, 0.0  ;;  %v1214_v12 = vld [vmem:[%s1778_s5 + $0x60] sm:$0xff] }
  0x97   : > { %335 = vadd.xlane.f32.xlu0 %v334_v13  ;;  %v755_v13 = vld [vmem:[%s1779_s6] sm:$0xff] }
 0x10a   : > { %v336_v36 = vpop.xlane.xlu0 %335 }
 0x10b   : > { %v337_v40 = vmul.f32 %v336_v36, %v330_v8  ;;  %v1215_v8 = vld [vmem:[%s1778_s5 + $0x68] sm:$0xff] }
 0x10d   : > { %v338_v46 = vadd.f32 1e-05, %v337_v40 }
 0x10f   : > { %1306 = vrsqrt.f32 %v338_v46  ;;  %vm345_vm3 = vweird.f32 %v338_v46 }
 0x115   : > { %v1307_v49 = vpop.eup %1306 }
 0x116   : > { %v340_v50 = vmul.f32 %v1307_v49, %v338_v46  ;;  %vm346_vm2 = vweird.f32 %v1307_v49 }
 0x117   : > { %vm347_vm4 = vmor %vm345_vm3, %vm346_vm2 }
 0x118   : > { %v341_v51 = vmul.f32 %v1307_v49, %v340_v50 }
 0x11a   : > { %v342_v52 = vmul.f32 0.5, %v341_v51  ;;  %v1303_v51 = vld [vmem:[%s1780_s7] ss:$0 sm:$0xff] }
 0x11b   : > { %688 = vst.msk [vmem:[#allocation5] sm:$0xff] %vm320_vm0, %v1303_v51 }
 0x11c   : > { %v343_v53 = vsub.f32 1.5, %v342_v52 }
 0x11e   : > { %v344_v54 = vmul.f32 %v1307_v49, %v343_v53 }
 0x120   : > { %v348_v56 = vsel %vm347_vm4, %v1307_v49, %v344_v54 }
 0x121   : > { %v349_v58 = vmul.f32 %v348_v56, %v1511_v11  ;;  %v1209_v11 = vld [vmem:[%s1777_s4 + $0x60] sm:$0xff] }
 0x123   : > { %v354_v59 = vmul.f32 %v1301_v55, %v349_v58 }
 0x125   : > { %v359_v60 = vadd.f32 %v1302_v57, %v354_v59 }
 0x127   : > { %1171 = vmatmul.msk.f32.vlgmr.msra.gmra.mxu0 %vm320_vm0, %v359_v60  ;;  %1172 = vmatmul.msk.f32.vlgmr.msra.gmra.mxu1 %vm320_vm0, %v359_v60 }
 0x128   : > { %1173 = vmatmul.msk.f32.vlgmr.msra.gmra.mxu2 %vm320_vm0, %v359_v60  ;;  %1178 = vmatmul.msk.f32.vlgmr.msra.gmra.mxu3 %vm320_vm0, %v359_v60 }
 0x129   : > { %591 = vmatpush.msra.mxu0 %v1202_v61  ;;  %618 = vmatpush.msra.mxu1 %v1207_v62  ;;  %v754_v62 = vld [vmem:[#allocation5] sm:$0xff] }
 0x12a   : > { %645 = vmatpush.msra.mxu2 %v1212_v63  ;;  %672 = vmatpush.msra.mxu3 %v1217_v0 }
 0x12b   : > { %592 = vmatpush.msra.mxu0 %v1201_v1  ;;  %619 = vmatpush.msra.mxu1 %v1206_v2 }
 0x12c   : > { %646 = vmatpush.msra.mxu2 %v1211_v3  ;;  %673 = vmatpush.msra.mxu3 %v1216_v4 }
 0x12d   : > { %593 = vmatpush.msra.mxu0 %v1200_v5  ;;  %620 = vmatpush.msra.mxu1 %v1205_v6 }
 0x12e   : > { %647 = vmatpush.msra.mxu2 %v1210_v7  ;;  %674 = vmatpush.msra.mxu3 %v1215_v8 }
 0x12f   : > { %1183 = vmatmul.msk.f32.vlgmr.msrb.gmra.mxu0 %vm320_vm0, %v359_v60  ;;  %1188 = vmatmul.msk.f32.vlgmr.msrb.gmra.mxu1 %vm320_vm0, %v359_v60 }
 0x130   : > { %1193 = vmatmul.msk.f32.vlgmr.msrb.gmra.mxu2 %vm320_vm0, %v359_v60  ;;  %1198 = vmatmul.msk.f32.vlgmr.msrb.gmra.mxu3 %vm320_vm0, %v359_v60 }
 0x131   : > { %594 = vmatpush.msra.mxu0 %v1199_v9  ;;  %621 = vmatpush.msra.mxu1 %v1204_v10 }
 0x132   : > { %648 = vmatpush.msra.mxu2 %v1209_v11  ;;  %675 = vmatpush.msra.mxu3 %v1214_v12 }
 0x134   : > { %774 = vmatpush.msrb.mxu2 %v755_v13 }
 0x137   : > { %1203 = vmatmul.msk.f32.vlgmr.msra.gmra.mxu0 %vm320_vm0, %v359_v60  ;;  %1208 = vmatmul.msk.f32.vlgmr.msra.gmra.mxu1 %vm320_vm0, %v359_v60 }
 0x138   : > { %1213 = vmatmul.msk.f32.vlgmr.msra.gmra.mxu2 %vm320_vm0, %v359_v60  ;;  %1218 = vmatmul.msk.f32.vlgmr.msra.gmra.mxu3 %vm320_vm0, %v359_v60 }
 0x1a4   : > { %v384_v14 = vpop.f32.mrf.mxu0  ;;  %v410_v15 = vpop.f32.mrf.mxu1 }
 0x1a5   : > { %388 = vst.msk [vmem:[#allocation2] sm:$0xff] %vm387_vm5, %v384_v14 }
 0x1a6   : > { %413 = vst.msk [vmem:[#allocation3] sm:$0xff] %vm387_vm5, %v410_v15 }
 0x1ab   : > { %v435_v16 = vpop.f32.mrf.mxu2  ;;  %v461_v17 = vpop.f32.mrf.mxu3 }
 0x1ac   : > { %438 = vst.msk [vmem:[#allocation4] sm:$0xff] %vm387_vm5, %v435_v16  ;;  %v488_v18 = vpop.f32.mrf.mxu0  ;;  %v515_v19 = vpop.f32.mrf.mxu1  ;;  %v690_v21 = vld [vmem:[#allocation2] sm:$0xff] }
 0x1ad   : > { %465 = vst.msk [vmem:[#allocation2 + $0x8] sm:$0xff] %vm387_vm5, %v461_v17  ;;  %v691_v20 = vld [vmem:[#allocation3] sm:$0xff] }
 0x1ae   : > { %492 = vst.msk [vmem:[#allocation3 + $0x8] sm:$0xff] %vm387_vm5, %v488_v18  ;;  %1219 = vmatpush.xpose.msk.msrb.mxu0 %vm387_vm5, %v691_v20  ;;  %v1233_v18 = vld [vmem:[%s1779_s6 + $0x10] sm:$0xff] }
 0x1af   : > { %519 = vst.msk [vmem:[#allocation4 + $0x8] sm:$0xff] %vm387_vm5, %v515_v19  ;;  %v1239_v19 = vld [vmem:[%s1779_s6 + $0x18] sm:$0xff] }
 0x1b1   : > { %1220 = vmatmul.msk.f32.vlgmr.msrb.gmra.mxu0 %vm387_vm5, %v690_v21 }
 0x1b3   : > { %v542_v22 = vpop.f32.mrf.mxu2  ;;  %v569_v23 = vpop.f32.mrf.mxu3  ;;  %v692_v24 = vld [vmem:[#allocation4] sm:$0xff] }
 0x1b4   : > { %546 = vst.msk [vmem:[#allocation2 + $0x10] sm:$0xff] %vm387_vm5, %v542_v22  ;;  %747 = vmatpush.msrb.mxu1 %v692_v24  ;;  %v596_v25 = vpop.f32.mrf.mxu0  ;;  %v623_v26 = vpop.f32.mrf.mxu1  ;;  %v1223_v29 = vld [vmem:[#allocation2 + $0x8] sm:$0xff] }
 0x1b5   : > { %573 = vst.msk [vmem:[#allocation3 + $0x10] sm:$0xff] %vm387_vm5, %v569_v23  ;;  %v785_v27 = vld [vmem:[#allocation3 + $0x8] sm:$0xff] }
 0x1b6   : > { %600 = vst.msk [vmem:[#allocation4 + $0x10] sm:$0xff] %vm387_vm5, %v596_v25  ;;  %1224 = vmatpush.xpose.msk.msrb.mxu3 %vm387_vm5, %v785_v27  ;;  %v787_v28 = vld [vmem:[#allocation4 + $0x8] sm:$0xff]  ;;  %869 = vmatpush.msra.mxu1 %v1227_v38 }
 0x1b7   : > { %627 = vst.msk [vmem:[#allocation2 + $0x18] sm:$0xff] %vm387_vm5, %v623_v26  ;;  %841 = vmatpush.msra.mxu0 %v787_v28 }
 0x1b9   : > { %1225 = vmatmul.msk.f32.vlgmr.msrb.gmra.mxu3 %vm387_vm5, %v1223_v29  ;;  %964 = vmatpush.msrb.mxu0 %v1233_v18 }
 0x1bb   : > { %v650_v30 = vpop.f32.mrf.mxu2  ;;  %v677_v31 = vpop.f32.mrf.mxu3  ;;  %v1229_v57 = vld [vmem:[#allocation2 + $0x10] sm:$0xff] }
 0x1bc   : > { %654 = vst.msk [vmem:[#allocation3 + $0x18] sm:$0xff] %vm387_vm5, %v650_v30  ;;  %v880_v32 = vld [vmem:[#allocation3 + $0x10] sm:$0xff] }
 0x1bd   : > { %681 = vst.msk [vmem:[#allocation4 + $0x18] sm:$0xff] %vm387_vm5, %v677_v31  ;;  %1230 = vmatpush.xpose.msk.msra.mxu2 %vm387_vm5, %v880_v32  ;;  %v882_v33 = vld [vmem:[#allocation4 + $0x10] sm:$0xff] }
 0x1be   : > { %936 = vmatpush.msra.mxu3 %v882_v33  ;;  %v1235_v61 = vld [vmem:[#allocation2 + $0x18] sm:$0xff] }
 0x1c0   : > { %1059 = vmatpush.msrb.mxu3 %v1239_v19 }
 0x1c3   : > { %v975_v43 = vld [vmem:[#allocation3 + $0x18] sm:$0xff] }
 0x1c4   : > { %v977_v55 = vld [vmem:[#allocation4 + $0x18] sm:$0xff] }
 0x22e   : > { %v717_v34 = vpop.f32.mrf.mxu0 }
 0x22f   : > { %v720_v35 = vsel %vm387_vm5, %v717_v34, -inf }
 0x230   : > { %721 = vmax.xlane.f32.xlu1 %v720_v35 }
 0x23c   : > { %v811_v36 = vpop.f32.mrf.mxu3 }
 0x23d   : > { %v814_v37 = vsel %vm387_vm5, %v811_v36, -inf }
 0x23e   : > { %815 = vmax.xlane.f32.xlu1 %v814_v37 }
 0x2a3   : > { %v722_v39 = vpop.xlane.xlu1 %721 }
 0x2a4   : > { %v723_v40 = vsub.f32 %v717_v34, %v722_v39 }
 0x2a6   : > { %v724_v41 = vmul.f32 1.442695, %v723_v40 }
 0x2a8   : > { %1308 = vpow2.f32 %v724_v41 }
 0x2ae   : > { %v1309_v42 = vpop.eup %1308 }
 0x2af   : > { %1221 = vmatmul.msk.f32.vlgmr.msrb.gmra.mxu1 %vm387_vm5, %v1309_v42  ;;  %v726_v44 = vsel %vm387_vm5, %v1309_v42, 0.0 }
 0x2b0   : > { %1236 = vmatpush.xpose.msk.msrb.mxu1 %vm387_vm5, %v975_v43  ;;  %727 = vadd.xlane.f32.xlu2 %v726_v44 }
 0x2b1   : > { %v816_v45 = vpop.xlane.xlu1 %815 }
 0x2b2   : > { %v817_v46 = vsub.f32 %v811_v36, %v816_v45 }
 0x2b4   : > { %v818_v47 = vmul.f32 1.442695, %v817_v46 }
 0x2b6   : > { %1310 = vpow2.f32 %v818_v47 }
 0x2bc   : > { %v1311_v48 = vpop.eup %1310 }
 0x2bd   : > { %1226 = vmatmul.msk.f32.vlgmr.msra.gmra.mxu0 %vm387_vm5, %v1311_v48  ;;  %v820_v49 = vsel %vm387_vm5, %v1311_v48, 0.0 }
 0x2be   : > { %821 = vadd.xlane.f32.xlu2 %v820_v49 }
 0x323   : > { %v728_v50 = vpop.xlane.xlu2 %727 }
 0x324   : > { %1312 = vrcp.f32 %v728_v50 }
 0x32a   : > { %v1313_v52 = vpop.eup %1312 }
 0x32c   : > { %v749_v53 = vpop.f32.mrf.mxu1 }
 0x32d   : > { %v753_v54 = vmul.f32 %v1313_v52, %v749_v53 }
 0x32f   : > { %1222 = vmatmul.msk.f32.vlgmr.msrb.gmra.mxu2 %vm387_vm5, %v753_v54 }
 0x330   : > { %1031 = vmatpush.msrb.mxu2 %v977_v55 }
 0x331   : > { %v822_v56 = vpop.xlane.xlu2 %821 }
 0x332   : > { %1314 = vrcp.f32 %v822_v56 }
 0x337   : > { %1231 = vmatmul.msk.f32.vlgmr.msra.gmra.mxu2 %vm387_vm5, %v1229_v57 }
 0x338   : > { %v1315_v58 = vpop.eup %1314 }
 0x33a   : > { %v843_v59 = vpop.f32.mrf.mxu0 }
 0x33b   : > { %v847_v60 = vmul.f32 %v1315_v58, %v843_v59 }
 0x33d   : > { %1228 = vmatmul.msk.f32.vlgmr.msra.gmra.mxu1 %vm387_vm5, %v847_v60 }
 0x345   : > { %1237 = vmatmul.msk.f32.vlgmr.msrb.gmra.mxu1 %vm387_vm5, %v1235_v61 }
 0x3b2   : > { %v776_v63 = vpop.f32.mrf.mxu2 }
 0x3b3   : > { %v779_v0 = vadd.f32 %v776_v63, %v754_v62 }
 0x3b5   : > { %780 = vst.msk [vmem:[#allocation5] sm:$0xff] %vm320_vm0, %v779_v0 }
 0x3ba   : > { %v871_v1 = vpop.f32.mrf.mxu1  ;;  %v906_v2 = vpop.f32.mrf.mxu2 }
 0x3bb   : > { %v909_v3 = vsel %vm387_vm5, %v906_v2, -inf }
 0x3bc   : > { %v848_v4 = vld [vmem:[#allocation5] sm:$0xff]  ;;  %910 = vmax.xlane.f32.xlu0 %v909_v3 }
 0x3bd   : > { %v874_v5 = vadd.f32 %v871_v1, %v848_v4 }
 0x3bf   : > { %875 = vst.msk [vmem:[#allocation5] sm:$0xff] %vm320_vm0, %v874_v5 }
 0x3c2   : > { %v1001_v6 = vpop.f32.mrf.mxu1 }
 0x3c3   : > { %v1004_v7 = vsel %vm387_vm5, %v1001_v6, -inf }
 0x3c4   : > { %1005 = vmax.xlane.f32.xlu1 %v1004_v7 }
 0x3c6   : > { %v943_v28 = vld [vmem:[#allocation5] sm:$0xff] }
 0x42f   : > { %v911_v8 = vpop.xlane.xlu0 %910 }
 0x430   : > { %v912_v9 = vsub.f32 %v906_v2, %v911_v8 }
 0x432   : > { %v913_v10 = vmul.f32 1.442695, %v912_v9 }
 0x434   : > { %1316 = vpow2.f32 %v913_v10 }
 0x437   : > { %v1006_v11 = vpop.xlane.xlu1 %1005 }
 0x438   : > { %v1007_v12 = vsub.f32 %v1001_v6, %v1006_v11 }
 0x43a   : > { %v1317_v13 = vpop.eup %1316  ;;  %v1008_v14 = vmul.f32 1.442695, %v1007_v12 }
 0x43b   : > { %1232 = vmatmul.msk.f32.vlgmr.msra.gmra.mxu3 %vm387_vm5, %v1317_v13  ;;  %v915_v15 = vsel %vm387_vm5, %v1317_v13, 0.0 }
 0x43c   : > { %1318 = vpow2.f32 %v1008_v14  ;;  %916 = vadd.xlane.f32.xlu2 %v915_v15 }
 0x442   : > { %v1319_v16 = vpop.eup %1318 }
 0x443   : > { %1238 = vmatmul.msk.f32.vlgmr.msrb.gmra.mxu2 %vm387_vm5, %v1319_v16  ;;  %v1010_v17 = vsel %vm387_vm5, %v1319_v16, 0.0 }
 0x444   : > { %1011 = vadd.xlane.f32.xlu0 %v1010_v17 }
 0x4af   : > { %v917_v20 = vpop.xlane.xlu2 %916 }
 0x4b0   : > { %1320 = vrcp.f32 %v917_v20 }
 0x4b6   : > { %v1321_v22 = vpop.eup %1320 }
 0x4b7   : > { %v1012_v21 = vpop.xlane.xlu0 %1011 }
 0x4b8   : > { %1322 = vrcp.f32 %v1012_v21 }
 0x4be   : > { %v938_v23 = vpop.f32.mrf.mxu3  ;;  %v1323_v25 = vpop.eup %1322 }
 0x4bf   : > { %v942_v24 = vmul.f32 %v1321_v22, %v938_v23 }
 0x4c1   : > { %1234 = vmatmul.msk.f32.vlgmr.msrb.gmra.mxu0 %vm387_vm5, %v942_v24 }
 0x4c6   : > { %v1033_v26 = vpop.f32.mrf.mxu2 }
 0x4c7   : > { %v1037_v27 = vmul.f32 %v1323_v25, %v1033_v26 }
 0x4c9   : > { %1240 = vmatmul.msk.f32.vlgmr.msrb.gmra.mxu3 %vm387_vm5, %v1037_v27 }
 0x53e   : > { %v966_v29 = vpop.f32.mrf.mxu0 }
 0x53f   : > { %v969_v30 = vadd.f32 %v966_v29, %v943_v28 }
 0x541   : > { %970 = vst.msk [vmem:[#allocation5] sm:$0xff] %vm320_vm0, %v969_v30 }
 0x548   : > { %v1038_v31 = vld [vmem:[#allocation5] sm:$0xff] }
 0x54c   : > { %v1061_v32 = vpop.f32.mrf.mxu3 }
 0x54d   : > { %v1064_v33 = vadd.f32 %v1061_v32, %v1038_v31 }
 0x54f   : > { %1065 = vst.msk [vmem:[#allocation5] sm:$0xff] %vm320_vm0, %v1064_v33 }
 0x556   : > { %v1066_v34 = vld [vmem:[#allocation5] sm:$0xff] }
 0x557   : > { %1067 = vst.msk [vmem:[%s310_s20] sm:$0xff] %vm320_vm0, %v1066_v34 }
 0x558   : > { %1351 = shalt.err (!%p1348_p5)
}
 0x559   : > { %1245 = dma.vmem_to_hbm [thread:$0]  (%p1490_p4), %s1083_s21, 128, %s1085_s22, %s1069_s23  }
 0x55a PF: > { %p1251_p6 = scmp.ge.s32.totalorder %s1402_s10, 2  ;;  %s1096_s26 = sand.u32 1, %s1382_s27  }
 0x55b   : > { %s1097_s0 = scalar_lea.sflag [#allocation7], %s1096_s26 }
 0x55c   : > { %p1248_p7 = pnand %p1251_p6, %p1497_p8 }
 0x55e   : > { %p1249_p9 = pneg %p1248_p7 }
 0x560   : > { %1377 = dma.done.wait (%p1249_p9), %s1097_s0, 128  }
 0x561   : > { %1379 = vsyncadd (%p1249_p9), %s1097_s0, 4294967168  ;;  %s21_s10 = sadd.s32 1, %s1402_s10   ;;  %s1786_s27 = smov %s1386_s28 }
 0x562   : > { %p18_p10 = scmp.ge.s32.totalorder %s21_s10, 4   ;;  %s1787_s28 = smov %s1390_s29 }
 0x563   : > { %s1788_s29 = smov %s1503_s18  ;;  %s1789_s30 = smov %s1398_s9 }
 0x564   : > { %s1790_s9 = smov %s1792_s13  ;;  %20 = sbr.rel (!%p18_p10) target bundleno = 6 (0x6), region = 122 }
 0x569   :  { %1103 = vsyncpa [#allocation7], 1 }
 0x56a   :  { %1105 = vsyncpa [#allocation7 + $0x1], 1 }

</bundles_post_ra>
